<compile_context>
chip_gen: v6e
topology: v6e:2x2x1
jax: 0.10.0
libtpu: 0.0.40
codegen_flags: <defaults>
</compile_context>

<pallas_src>
import functools

import jax
import jax.numpy as jnp
from jax import lax
from jax.experimental import pallas as pl
from jax.experimental.pallas import tpu as pltpu

DROPOUT_P = 0.5  # module default dropout_p


def _srl(x, k):
    """Logical right shift of an int32 array by the constant k."""
    return lax.shift_right_logical(x, jnp.full(x.shape, k, jnp.int32))


def _hash_i32(x):
    """Cheap int32 mixer (Mueller/degski-style); wrap-around arithmetic is fine."""
    c = jnp.int32(0x45D9F3B)
    x = (x ^ _srl(x, 16)) * c
    x = (x ^ _srl(x, 16)) * c
    x = x ^ _srl(x, 16)
    return x


def sdpa_dropout_kernel(seed_ref, scale_ref, q_ref, k_ref, v_ref, o_ref, *,
                        dropout_p, bb, lq, lk):
    g = pl.program_id(0)

    q = q_ref[...].astype(jnp.float32)   # (bb, Lq, D)
    k = k_ref[...].astype(jnp.float32)   # (bb, Lk, D)
    v = v_ref[...].astype(jnp.float32)   # (bb, Lk, Dv)

    # qk = Q @ K^T (batched, contract on D; no explicit transpose), then scale.
    s = jnp.einsum("bqd,bkd->bqk", q, k, preferred_element_type=jnp.float32)
    s = s * scale_ref[0]

    # Numerically stable softmax along the last dim.
    m = jnp.max(s, axis=-1, keepdims=True)
    e = jnp.exp(s - m)
    denom = jnp.sum(e, axis=-1, keepdims=True)
    p = e * pl.reciprocal(denom, approx=True)

    # Dropout with PyTorch training-mode semantics (inverted 1/(1-p) scaling).
    if dropout_p >= 1.0:
        p = jnp.zeros_like(p)
    elif dropout_p > 0.0:
        # Counter-based hash PRNG over the *global* element index.
        b_idx = lax.broadcasted_iota(jnp.int32, s.shape, 0) + g * bb
        q_idx = lax.broadcasted_iota(jnp.int32, s.shape, 1)
        k_idx = lax.broadcasted_iota(jnp.int32, s.shape, 2)
        lin = (b_idx * lq + q_idx) * lk + k_idx
        x = lin + seed_ref[0] * jnp.int32(1640531527)
        u24 = _hash_i32(x) & jnp.int32(0xFFFFFF)          # uniform in [0, 2^24)
        thresh = jnp.int32(int(dropout_p * (1 << 24)))    # drop iff u24 < thresh
        keep = u24 >= thresh
        p = jnp.where(keep, p * (1.0 / (1.0 - dropout_p)), 0.0)

    # output = dropout_qk @ V (batched).
    o_ref[...] = jnp.einsum("bqk,bkd->bqd", p.astype(v.dtype), v,
                            preferred_element_type=jnp.float32).astype(o_ref.dtype)


def _pick_batch_block(b, max_bb=8):
    bb = min(b, max_bb)
    while b % bb:
        bb -= 1
    return bb


def sdpa_dropout(query, key, value, scale_factor, seed, dropout_p=DROPOUT_P):
    B, Lq, D = query.shape
    Bk, Lk, Dk = key.shape
    Bv, Lv, Dv = value.shape
    assert Bk == B and Bv == B and Dk == D and Lv == Lk

    bb = _pick_batch_block(B)
    grid = (B // bb,)

    seed_arr = jnp.asarray([seed], dtype=jnp.int32)
    scale_arr = jnp.asarray([scale_factor], dtype=jnp.float32)

    kernel = functools.partial(sdpa_dropout_kernel,
                               dropout_p=float(dropout_p), bb=bb, lq=Lq, lk=Lk)

    grid_spec = pltpu.PrefetchScalarGridSpec(
        num_scalar_prefetch=2,            # seed, scale_factor (land in SMEM)
        grid=grid,
        in_specs=[
            pl.BlockSpec((bb, Lq, D), lambda g, seed, scale: (g, 0, 0)),
            pl.BlockSpec((bb, Lk, D), lambda g, seed, scale: (g, 0, 0)),
            pl.BlockSpec((bb, Lk, Dv), lambda g, seed, scale: (g, 0, 0)),
        ],
        out_specs=pl.BlockSpec((bb, Lq, Dv), lambda g, seed, scale: (g, 0, 0)),
    )

    return pl.pallas_call(
        kernel,
        out_shape=jax.ShapeDtypeStruct((B, Lq, Dv), jnp.float32),
        grid_spec=grid_spec,
        compiler_params=pltpu.CompilerParams(
            dimension_semantics=("parallel",)),
    )(seed_arr, scale_arr, query, key, value)


if __name__ == "__main__":
    # Small shapes consistent with the forward pass:
    #   query (B, Lq, D), key (B, Lk, D), value (B, Lk, Dv)
    # (Lk, D, Dv kept as multiples of 128 for lane-dense layout.)
    B, Lq, Lk, D, Dv = 2, 64, 128, 128, 128
    scale_factor = 1.0

    k0, k1, k2 = jax.random.split(jax.random.PRNGKey(0), 3)
    query = jax.random.normal(k0, (B, Lq, D), dtype=jnp.float32)
    key = jax.random.normal(k1, (B, Lk, D), dtype=jnp.float32)
    value = jax.random.normal(k2, (B, Lk, Dv), dtype=jnp.float32)

    # Dropout path (module default p=0.5).
    out = sdpa_dropout(query, key, value, scale_factor, seed=1234)
    out = jax.block_until_ready(out)
    assert out.shape == (B, Lq, Dv), out.shape
    assert bool(jnp.all(jnp.isfinite(out)))

    # Deterministic correctness check: dropout_p=0 must match the pure-JAX ref.
    out_nodrop = sdpa_dropout(query, key, value, scale_factor, seed=0,
                              dropout_p=0.0)
    out_nodrop = jax.block_until_ready(out_nodrop)
    ref_attn = jax.nn.softmax(
        jnp.einsum("bqd,bkd->bqk", query, key) * scale_factor, axis=-1)
    ref = jnp.einsum("bqk,bkd->bqd", ref_attn, value)
    assert bool(jnp.allclose(out_nodrop, ref, atol=2e-2, rtol=2e-2)), (
        float(jnp.max(jnp.abs(out_nodrop - ref))))

    print("KERNEL_OK")
</pallas_src>

<mosaic_0001>
module attributes {stable_mosaic.version = 11 : i64} {
  func.func @sdpa_dropout_kernel(%arg0: i32, %arg1: memref<1xi32, #tpu.memory_space<smem>>, %arg2: memref<1xf32, #tpu.memory_space<smem>>, %arg3: memref<2x64x128xf32, #tpu.memory_space<vmem>>, %arg4: memref<2x128x128xf32, #tpu.memory_space<vmem>>, %arg5: memref<2x128x128xf32, #tpu.memory_space<vmem>>, %arg6: memref<2x64x128xf32, #tpu.memory_space<vmem>>) attributes {dimension_semantics = [#tpu.dimension_semantics<parallel>], iteration_bounds = array<i64: 1>, scalar_prefetch = 2 : i64, scratch_operands = 0 : i64, tpu.core_type = #tpu.core_type<tc>, window_params = [{transform_indices = @transform_0, window_bounds = array<i64: 2, 64, 128>}, {transform_indices = @transform_1, window_bounds = array<i64: 2, 128, 128>}, {transform_indices = @transform_2, window_bounds = array<i64: 2, 128, 128>}, {transform_indices = @transform_3, window_bounds = array<i64: 2, 64, 128>}]} {
    %c0 = arith.constant 0 : index
    %c0_0 = arith.constant 0 : index
    %c0_1 = arith.constant 0 : index
    %0 = vector.load %arg3[%c0, %c0_0, %c0_1] : memref<2x64x128xf32, #tpu.memory_space<vmem>>, vector<2x64x128xf32>
    %c0_2 = arith.constant 0 : index
    %c0_3 = arith.constant 0 : index
    %c0_4 = arith.constant 0 : index
    %1 = vector.load %arg4[%c0_2, %c0_3, %c0_4] : memref<2x128x128xf32, #tpu.memory_space<vmem>>, vector<2x128x128xf32>
    %c0_5 = arith.constant 0 : index
    %c0_6 = arith.constant 0 : index
    %c0_7 = arith.constant 0 : index
    %2 = vector.load %arg5[%c0_5, %c0_6, %c0_7] : memref<2x128x128xf32, #tpu.memory_space<vmem>>, vector<2x128x128xf32>
    "tpu.trace_start"() <{level = 10 : i32, message = "bqd,bkd->bqk"}> : () -> ()
    %cst = arith.constant dense<0.000000e+00> : vector<2x64x128xf32>
    %3 = tpu.matmul %0, %1, %cst {dimension_numbers = #tpu.dot_dimension_numbers<[2], [2], [1], [1], [0, 0, 0, 1, 1, 1], [0], [0]>} : vector<2x64x128xf32>, vector<2x128x128xf32>, vector<2x64x128xf32> -> vector<2x64x128xf32>
    "tpu.trace_stop"() : () -> ()
    %c0_8 = arith.constant 0 : index
    %4 = memref.load %arg2[%c0_8] : memref<1xf32, #tpu.memory_space<smem>>
    %5 = vector.broadcast %4 : f32 to vector<2x64x128xf32>
    %6 = arith.mulf %3, %5 : vector<2x64x128xf32>
    %cst_9 = arith.constant dense<0xFF800000> : vector<2x64xf32>
    %7 = vector.multi_reduction <maximumf>, %6, %cst_9 [2] : vector<2x64x128xf32> to vector<2x64xf32>
    %8 = vector.shape_cast %7 : vector<2x64xf32> to vector<2x64x1xf32>
    %9 = vector.broadcast %8 : vector<2x64x1xf32> to vector<2x64x128xf32>
    %10 = arith.subf %6, %9 : vector<2x64x128xf32>
    %11 = math.exp %10 : vector<2x64x128xf32>
    %cst_10 = arith.constant dense<0.000000e+00> : vector<2x64xf32>
    %12 = vector.multi_reduction <add>, %11, %cst_10 [2] : vector<2x64x128xf32> to vector<2x64xf32>
    %13 = vector.shape_cast %12 : vector<2x64xf32> to vector<2x64x1xf32>
    %14 = tpu.reciprocal %13 {approx = true} : vector<2x64x1xf32> -> vector<2x64x1xf32>
    %15 = vector.broadcast %14 : vector<2x64x1xf32> to vector<2x64x128xf32>
    %16 = arith.mulf %11, %15 : vector<2x64x128xf32>
    %17 = tpu.iota {dimensions = array<i32: 0>} : vector<2x64x128xi32>
    %c2_i32 = arith.constant 2 : i32
    %18 = arith.muli %arg0, %c2_i32 : i32
    %19 = vector.broadcast %18 : i32 to vector<2x64x128xi32>
    %20 = arith.addi %17, %19 : vector<2x64x128xi32>
    %21 = tpu.iota {dimensions = array<i32: 1>} : vector<2x64x128xi32>
    %22 = tpu.iota {dimensions = array<i32: 2>} : vector<2x64x128xi32>
    %c64_i32 = arith.constant 64 : i32
    %23 = vector.broadcast %c64_i32 : i32 to vector<2x64x128xi32>
    %24 = arith.muli %20, %23 : vector<2x64x128xi32>
    %25 = arith.addi %24, %21 : vector<2x64x128xi32>
    %c128_i32 = arith.constant 128 : i32
    %26 = vector.broadcast %c128_i32 : i32 to vector<2x64x128xi32>
    %27 = arith.muli %25, %26 : vector<2x64x128xi32>
    %28 = arith.addi %27, %22 : vector<2x64x128xi32>
    %c0_11 = arith.constant 0 : index
    %29 = memref.load %arg1[%c0_11] : memref<1xi32, #tpu.memory_space<smem>>
    %c1640531527_i32 = arith.constant 1640531527 : i32
    %30 = arith.muli %29, %c1640531527_i32 : i32
    %31 = vector.broadcast %30 : i32 to vector<2x64x128xi32>
    %32 = arith.addi %28, %31 : vector<2x64x128xi32>
    %c16_i32 = arith.constant 16 : i32
    %33 = vector.broadcast %c16_i32 : i32 to vector<2x64x128xi32>
    %34 = arith.shrui %32, %33 : vector<2x64x128xi32>
    %35 = arith.xori %32, %34 : vector<2x64x128xi32>
    %c73244475_i32 = arith.constant 73244475 : i32
    %36 = vector.broadcast %c73244475_i32 : i32 to vector<2x64x128xi32>
    %37 = arith.muli %35, %36 : vector<2x64x128xi32>
    %c16_i32_12 = arith.constant 16 : i32
    %38 = vector.broadcast %c16_i32_12 : i32 to vector<2x64x128xi32>
    %39 = arith.shrui %37, %38 : vector<2x64x128xi32>
    %40 = arith.xori %37, %39 : vector<2x64x128xi32>
    %c73244475_i32_13 = arith.constant 73244475 : i32
    %41 = vector.broadcast %c73244475_i32_13 : i32 to vector<2x64x128xi32>
    %42 = arith.muli %40, %41 : vector<2x64x128xi32>
    %c16_i32_14 = arith.constant 16 : i32
    %43 = vector.broadcast %c16_i32_14 : i32 to vector<2x64x128xi32>
    %44 = arith.shrui %42, %43 : vector<2x64x128xi32>
    %45 = arith.xori %42, %44 : vector<2x64x128xi32>
    %c16777215_i32 = arith.constant 16777215 : i32
    %46 = vector.broadcast %c16777215_i32 : i32 to vector<2x64x128xi32>
    %47 = arith.andi %45, %46 : vector<2x64x128xi32>
    %c8388608_i32 = arith.constant 8388608 : i32
    %48 = vector.broadcast %c8388608_i32 : i32 to vector<2x64x128xi32>
    %49 = arith.cmpi sge, %47, %48 : vector<2x64x128xi32>
    %cst_15 = arith.constant 2.000000e+00 : f32
    %50 = vector.broadcast %cst_15 : f32 to vector<2x64x128xf32>
    %51 = arith.mulf %16, %50 : vector<2x64x128xf32>
    %cst_16 = arith.constant 0.000000e+00 : f32
    %52 = vector.broadcast %cst_16 : f32 to vector<2x64x128xf32>
    %53 = arith.select %49, %51, %52 : vector<2x64x128xi1>, vector<2x64x128xf32>
    "tpu.trace_start"() <{level = 10 : i32, message = "bqk,bkd->bqd"}> : () -> ()
    %cst_17 = arith.constant dense<0.000000e+00> : vector<2x64x128xf32>
    %54 = tpu.matmul %53, %2, %cst_17 {dimension_numbers = #tpu.dot_dimension_numbers<[2], [1], [1], [2], [0, 0, 0, 1, 1, 2], [0], [0]>} : vector<2x64x128xf32>, vector<2x128x128xf32>, vector<2x64x128xf32> -> vector<2x64x128xf32>
    "tpu.trace_stop"() : () -> ()
    %c0_18 = arith.constant 0 : index
    %c0_19 = arith.constant 0 : index
    %c0_20 = arith.constant 0 : index
    %55 = vector.load %arg6[%c0_18, %c0_19, %c0_20] : memref<2x64x128xf32, #tpu.memory_space<vmem>>, vector<2x64x128xf32>
    tpu.vector_store %arg6[%c0_18, %c0_19, %c0_20], %54 {strides = array<i32>} : memref<2x64x128xf32, #tpu.memory_space<vmem>>, vector<2x64x128xf32>,
    return
  }
  func.func @transform_0(%arg0: i32, %arg1: memref<1xi32, #tpu.memory_space<smem>>, %arg2: memref<1xf32, #tpu.memory_space<smem>>) -> (i32, i32, i32) {
    %c0_i32 = arith.constant 0 : i32
    %c0_i32_0 = arith.constant 0 : i32
    %c0_i32_1 = arith.constant 0 : i32
    return %arg0, %c0_i32, %c0_i32_0 : i32, i32, i32
  }
  func.func @transform_1(%arg0: i32, %arg1: memref<1xi32, #tpu.memory_space<smem>>, %arg2: memref<1xf32, #tpu.memory_space<smem>>) -> (i32, i32, i32) {
    %c0_i32 = arith.constant 0 : i32
    %c0_i32_0 = arith.constant 0 : i32
    %c0_i32_1 = arith.constant 0 : i32
    return %arg0, %c0_i32, %c0_i32_0 : i32, i32, i32
  }
  func.func @transform_2(%arg0: i32, %arg1: memref<1xi32, #tpu.memory_space<smem>>, %arg2: memref<1xf32, #tpu.memory_space<smem>>) -> (i32, i32, i32) {
    %c0_i32 = arith.constant 0 : i32
    %c0_i32_0 = arith.constant 0 : i32
    %c0_i32_1 = arith.constant 0 : i32
    return %arg0, %c0_i32, %c0_i32_0 : i32, i32, i32
  }
  func.func @transform_3(%arg0: i32, %arg1: memref<1xi32, #tpu.memory_space<smem>>, %arg2: memref<1xf32, #tpu.memory_space<smem>>) -> (i32, i32, i32) {
    %c0_i32 = arith.constant 0 : i32
    %c0_i32_0 = arith.constant 0 : i32
    %c0_i32_1 = arith.constant 0 : i32
    return %arg0, %c0_i32, %c0_i32_0 : i32, i32, i32
  }
}

</mosaic_0001>

<bundles_post_ra>
// kernel: tpu_custom_call.1
= control target key start
LH: loop header
LB: loop body
LE: loop exit
PB: predicated region body
PF: predicated region fallthrough
CT: control target
= control target key end

     0   :  { %12 = vsyncpa [#allocation6], 0  ;;  %s1797_s0 = inlined_call_operand.<no memory space> [shape: s32[1], index: 0, kind: input, shape index: {}]   ;;  %s1798_s1 = inlined_call_operand.<no memory space> [shape: f32[1], index: 1, kind: input, shape index: {}]   ;;  %s1799_s2 = inlined_call_operand.hbm [shape: f32[2,64,128], index: 2, kind: input, shape index: {}]   ;;  %s1800_s3 = inlined_call_operand.hbm [shape: f32[2,128,128], index: 3, kind: input, shape index: {}]   ;;  %s1801_s4 = inlined_call_operand.hbm [shape: f32[2,128,128], index: 4, kind: input, shape index: {}]   ;;  %s1802_s5 = inlined_call_operand.hbm [shape: f32[2,64,128], index: 5, kind: output, shape index: {}]  }
   0x1   :  { %13 = vsyncpa [#allocation9], 0 }
   0x2   :  { %14 = vsyncpa [#allocation7], 0  ;;  %s1475_s18 = smov [#allocation8]   ;;  %s1476_s20 = smov [#allocation5]  }
   0x3   :  { %s32_s19 = sshll.u32 %s1475_s18, 4  ;;  %s20_s21 = sshll.u32 %s1476_s20, 4  ;;  %s33_s19 = int_to_ptr.vmem [resolvable:$true] %s32_s19  ;;  %s21_s21 = int_to_ptr.vmem [resolvable:$true] %s20_s21 }
   0x4   :  { %s1397_s22 = scalar_lea.vmem %s33_s19, 4096  ;;  %p1402_p1 = scmp.lt.s32.totalorder %s33_s19, %s33_s19 }
   0x5   :  { %p1398_p0 = scmp.ne.s32.totalorder %s33_s19, %s1397_s22  ;;  %p1403_p2 = scmp.lt.s32.totalorder %s1397_s22, %s1397_s22 }
   0x7   :  { %p1404_p3 = por %p1403_p2, %p1402_p1 }
   0x9   :  { %p1405_p4 = pnand %p1404_p3, %p1398_p0 }
   0xb   :  { %1408 = shalt.err (!%p1405_p4)
}
   0xc   :  { %s1477_s23 = smov 128   ;;  %s1478_s24 = smov 8  }
   0xd   :  { %38 = dma.hbm_to_vmem [thread:$0]  %s1800_s3, 4096, %s33_s19, [#allocation9], %s1477_s23, %s1477_s23, %s1478_s24  }
   0xe   :  { %s1417_s27 = scalar_lea.vmem %s21_s21, 2048  ;;  %p1422_p6 = scmp.lt.s32.totalorder %s21_s21, %s21_s21 }
   0xf   :  { %p1418_p5 = scmp.ne.s32.totalorder %s21_s21, %s1417_s27  ;;  %p1423_p7 = scmp.lt.s32.totalorder %s1417_s27, %s1417_s27 }
  0x11   :  { %p1424_p8 = por %p1423_p7, %p1422_p6 }
  0x13   :  { %p1425_p9 = pnand %p1424_p8, %p1418_p5 }
  0x15   :  { %1428 = shalt.err (!%p1425_p9)
}
  0x16   :  { %26 = dma.hbm_to_vmem [thread:$0]  %s1799_s2, 2048, %s21_s21, [#allocation6], %s1477_s23, %s1477_s23, %s1478_s24  }
  0x17   :  { %s1479_s30 = smov [#allocation10]  }
  0x18   :  { %s44_s6 = sshll.u32 %s1479_s30, 4  ;;  %s45_s6 = int_to_ptr.vmem [resolvable:$true] %s44_s6 }
  0x19   :  { %s1437_s7 = scalar_lea.vmem %s45_s6, 4096  ;;  %p1442_p11 = scmp.lt.s32.totalorder %s45_s6, %s45_s6 }
  0x1a   :  { %p1438_p10 = scmp.ne.s32.totalorder %s45_s6, %s1437_s7  ;;  %p1443_p12 = scmp.lt.s32.totalorder %s1437_s7, %s1437_s7 }
  0x1c   :  { %p1444_p13 = por %p1443_p12, %p1442_p11 }
  0x1e   :  { %p1445_p0 = pnand %p1444_p13, %p1438_p10 }
  0x20   :  { %1448 = shalt.err (!%p1445_p0)
}
  0x21   :  { %50 = dma.hbm_to_vmem [thread:$0]  %s1801_s4, 4096, %s45_s6, [#allocation9], %s1477_s23, %s1477_s23, %s1478_s24  }
  0x22   :  { %1469 = dma.done.wait [#allocation6], 2048  }
  0x23   :  { %1470 = vsyncadd [#allocation6], 4294965248 }
  0x24   :  { %1471 = dma.done.wait [#allocation9], 8192  }
  0x25   :  { %1472 = vsyncadd [#allocation9], 4294959104  ;;  %v91_v0 = vld [vmem:[#allocation8 + $0x78] sm:$0xff]  ;;  %v90_v2 = vld [vmem:[#allocation8 + $0x70] sm:$0xff]  ;;  %v351_v48 = vstv %s1798_s1  ;;  %s577_s10 = smul.u32 1640531527, %s1797_s0 }
  0x26   :  { %v107_v1 = vld [vmem:[#allocation8 + $0xf8] sm:$0xff]  ;;  %1143 = vmatprep.subr.mxu0 %v91_v0  ;;  %v106_v3 = vld [vmem:[#allocation8 + $0xf0] sm:$0xff]  ;;  %v89_v4 = vld [vmem:[#allocation8 + $0x68] sm:$0xff]  ;;  %s1480_s0 = smov [#allocation11]  }
  0x27   :  { %1187 = vmatprep.subr.mxu1 %v107_v1  ;;  %1144 = vmatpush3.xpose.msra.mxu0 %v91_v0  ;;  %v105_v5 = vld [vmem:[#allocation8 + $0xe8] sm:$0xff]  ;;  %v88_v6 = vld [vmem:[#allocation8 + $0x60] sm:$0xff]  ;;  %v87_v10 = vld [vmem:[#allocation8 + $0x58] sm:$0xff]  ;;  %s1018_s11 = sshll.u32 %s1480_s0, 4  ;;  %s1019_s11 = int_to_ptr.vmem [resolvable:$true] %s1018_s11 }
  0x28   :  { %1188 = vmatpush3.xpose.msra.mxu1 %v107_v1  ;;  %1145 = vmatprep.subr.mxu0 %v90_v2  ;;  %v104_v7 = vld [vmem:[#allocation8 + $0xe0] sm:$0xff]  ;;  %v103_v11 = vld [vmem:[#allocation8 + $0xd8] sm:$0xff]  ;;  %v86_v12 = vld [vmem:[#allocation8 + $0x50] sm:$0xff]  ;;  %s1449_s12 = scalar_lea.vmem %s1019_s11, 2048  ;;  %p1454_p2 = scmp.lt.s32.totalorder %s1019_s11, %s1019_s11 }
  0x29   :  { %1189 = vmatprep.subr.mxu1 %v106_v3  ;;  %v60_v8 = vld [vmem:[#allocation5] sm:$0xff]  ;;  %v102_v13 = vld [vmem:[#allocation8 + $0xd0] sm:$0xff]  ;;  %v85_v14 = vld [vmem:[#allocation8 + $0x48] sm:$0xff]  ;;  %p1450_p1 = scmp.ne.s32.totalorder %s1019_s11, %s1449_s12  ;;  %p1455_p3 = scmp.lt.s32.totalorder %s1449_s12, %s1449_s12 }
  0x2a   :  { %v68_v9 = vld [vmem:[#allocation5 + $0x40] sm:$0xff]  ;;  %1175 = vmatprep.mubr.f32.mxu0 %v60_v8  ;;  %v101_v15 = vld [vmem:[#allocation8 + $0xc8] sm:$0xff]  ;;  %v83_v18 = vld [vmem:[#allocation8 + $0x38] sm:$0xff] }
  0x2b   :  { %1146 = vmatpush3.xpose.msra.mxu0 %v90_v2  ;;  %1219 = vmatprep.mubr.f32.mxu1 %v68_v9  ;;  %v84_v16 = vld [vmem:[#allocation8 + $0x40] sm:$0xff]  ;;  %v99_v19 = vld [vmem:[#allocation8 + $0xb8] sm:$0xff]  ;;  %v82_v20 = vld [vmem:[#allocation8 + $0x30] sm:$0xff]  ;;  %p1456_p4 = por %p1455_p3, %p1454_p2 }
  0x2c   :  { %1190 = vmatpush3.xpose.msra.mxu1 %v106_v3  ;;  %1147 = vmatprep.subr.mxu0 %v89_v4  ;;  %v100_v17 = vld [vmem:[#allocation8 + $0xc0] sm:$0xff]  ;;  %v98_v21 = vld [vmem:[#allocation8 + $0xb0] sm:$0xff]  ;;  %v81_v22 = vld [vmem:[#allocation8 + $0x28] sm:$0xff] }
  0x2d   :  { %1191 = vmatprep.subr.mxu1 %v105_v5  ;;  %v97_v23 = vld [vmem:[#allocation8 + $0xa8] sm:$0xff]  ;;  %v80_v24 = vld [vmem:[#allocation8 + $0x20] sm:$0xff]  ;;  %v79_v26 = vld [vmem:[#allocation8 + $0x18] sm:$0xff]  ;;  %p1457_p5 = pnand %p1456_p4, %p1450_p1 }
  0x2e   :  { %v96_v25 = vld [vmem:[#allocation8 + $0xa0] sm:$0xff]  ;;  %v95_v27 = vld [vmem:[#allocation8 + $0x98] sm:$0xff]  ;;  %v78_v28 = vld [vmem:[#allocation8 + $0x10] sm:$0xff] }
  0x2f   :  { %1148 = vmatpush3.xpose.msra.mxu0 %v89_v4  ;;  %v94_v29 = vld [vmem:[#allocation8 + $0x90] sm:$0xff]  ;;  %v77_v30 = vld [vmem:[#allocation8 + $0x8] sm:$0xff]  ;;  %v76_v32 = vld [vmem:[#allocation8] sm:$0xff] }
  0x30   :  { %1192 = vmatpush3.xpose.msra.mxu1 %v105_v5  ;;  %1149 = vmatprep.subr.mxu0 %v88_v6  ;;  %v93_v31 = vld [vmem:[#allocation8 + $0x88] sm:$0xff]  ;;  %v92_v33 = vld [vmem:[#allocation8 + $0x80] sm:$0xff]  ;;  %v70_v36 = vld [vmem:[#allocation5 + $0x50] sm:$0xff] }
  0x31   :  { %1193 = vmatprep.subr.mxu1 %v104_v7  ;;  %v61_v34 = vld [vmem:[#allocation5 + $0x8] sm:$0xff]  ;;  %v62_v37 = vld [vmem:[#allocation5 + $0x10] sm:$0xff]  ;;  %v71_v38 = vld [vmem:[#allocation5 + $0x58] sm:$0xff] }
  0x32   :  { %v69_v35 = vld [vmem:[#allocation5 + $0x48] sm:$0xff]  ;;  %v63_v39 = vld [vmem:[#allocation5 + $0x18] sm:$0xff]  ;;  %v72_v40 = vld [vmem:[#allocation5 + $0x60] sm:$0xff] }
  0x33   :  { %1150 = vmatpush3.xpose.msra.mxu0 %v88_v6  ;;  %v64_v41 = vld [vmem:[#allocation5 + $0x20] sm:$0xff]  ;;  %v73_v42 = vld [vmem:[#allocation5 + $0x68] sm:$0xff]  ;;  %v74_v44 = vld [vmem:[#allocation5 + $0x70] sm:$0xff] }
  0x34   :  { %1194 = vmatpush3.xpose.msra.mxu1 %v104_v7  ;;  %1151 = vmatprep.subr.mxu0 %v87_v10  ;;  %v65_v43 = vld [vmem:[#allocation5 + $0x28] sm:$0xff]  ;;  %v66_v45 = vld [vmem:[#allocation5 + $0x30] sm:$0xff]  ;;  %v75_v46 = vld [vmem:[#allocation5 + $0x78] sm:$0xff] }
  0x35   :  { %1195 = vmatprep.subr.mxu1 %v103_v11  ;;  %v67_v47 = vld [vmem:[#allocation5 + $0x38] sm:$0xff] }
  0x37   :  { %1152 = vmatpush3.xpose.msra.mxu0 %v87_v10 }
  0x38   :  { %1196 = vmatpush3.xpose.msra.mxu1 %v103_v11  ;;  %1153 = vmatprep.subr.mxu0 %v86_v12 }
  0x39   :  { %1197 = vmatprep.subr.mxu1 %v102_v13 }
  0x3b   :  { %1154 = vmatpush3.xpose.msra.mxu0 %v86_v12 }
  0x3c   :  { %1198 = vmatpush3.xpose.msra.mxu1 %v102_v13  ;;  %1155 = vmatprep.subr.mxu0 %v85_v14 }
  0x3d   :  { %1199 = vmatprep.subr.mxu1 %v101_v15 }
  0x3f   :  { %1156 = vmatpush3.xpose.msra.mxu0 %v85_v14 }
  0x40   :  { %1200 = vmatpush3.xpose.msra.mxu1 %v101_v15  ;;  %1157 = vmatprep.subr.mxu0 %v84_v16 }
  0x41   :  { %1201 = vmatprep.subr.mxu1 %v100_v17 }
  0x43   :  { %1158 = vmatpush3.xpose.msra.mxu0 %v84_v16 }
  0x44   :  { %1202 = vmatpush3.xpose.msra.mxu1 %v100_v17  ;;  %1159 = vmatprep.subr.mxu0 %v83_v18  ;;  %v123_v17 = vld [vmem:[#allocation10 + $0x78] sm:$0xff] }
  0x45   :  { %1203 = vmatprep.subr.mxu1 %v99_v19 }
  0x47   :  { %1160 = vmatpush3.xpose.msra.mxu0 %v83_v18  ;;  %v122_v18 = vld [vmem:[#allocation10 + $0x70] sm:$0xff] }
  0x48   :  { %1204 = vmatpush3.xpose.msra.mxu1 %v99_v19  ;;  %1161 = vmatprep.subr.mxu0 %v82_v20  ;;  %v139_v19 = vld [vmem:[#allocation10 + $0xf8] sm:$0xff] }
  0x49   :  { %1205 = vmatprep.subr.mxu1 %v98_v21 }
  0x4b   :  { %1162 = vmatpush3.xpose.msra.mxu0 %v82_v20  ;;  %v138_v20 = vld [vmem:[#allocation10 + $0xf0] sm:$0xff] }
  0x4c   :  { %1206 = vmatpush3.xpose.msra.mxu1 %v98_v21  ;;  %1163 = vmatprep.subr.mxu0 %v81_v22  ;;  %v121_v21 = vld [vmem:[#allocation10 + $0x68] sm:$0xff] }
  0x4d   :  { %1207 = vmatprep.subr.mxu1 %v97_v23 }
  0x4f   :  { %1164 = vmatpush3.xpose.msra.mxu0 %v81_v22  ;;  %v137_v22 = vld [vmem:[#allocation10 + $0xe8] sm:$0xff] }
  0x50   :  { %1208 = vmatpush3.xpose.msra.mxu1 %v97_v23  ;;  %1165 = vmatprep.subr.mxu0 %v80_v24  ;;  %v120_v23 = vld [vmem:[#allocation10 + $0x60] sm:$0xff] }
  0x51   :  { %1209 = vmatprep.subr.mxu1 %v96_v25 }
  0x53   :  { %1166 = vmatpush3.xpose.msra.mxu0 %v80_v24  ;;  %v119_v24 = vld [vmem:[#allocation10 + $0x58] sm:$0xff] }
  0x54   :  { %1210 = vmatpush3.xpose.msra.mxu1 %v96_v25  ;;  %1167 = vmatprep.subr.mxu0 %v79_v26 }
  0x55   :  { %1211 = vmatprep.subr.mxu1 %v95_v27 }
  0x57   :  { %1168 = vmatpush3.xpose.msra.mxu0 %v79_v26 }
  0x58   :  { %1212 = vmatpush3.xpose.msra.mxu1 %v95_v27  ;;  %1169 = vmatprep.subr.mxu0 %v78_v28 }
  0x59   :  { %1213 = vmatprep.subr.mxu1 %v94_v29 }
  0x5b   :  { %1170 = vmatpush3.xpose.msra.mxu0 %v78_v28 }
  0x5c   :  { %1214 = vmatpush3.xpose.msra.mxu1 %v94_v29  ;;  %1171 = vmatprep.subr.mxu0 %v77_v30 }
  0x5d   :  { %1215 = vmatprep.subr.mxu1 %v93_v31 }
  0x5f   :  { %1172 = vmatpush3.xpose.msra.mxu0 %v77_v30 }
  0x60   :  { %1216 = vmatpush3.xpose.msra.mxu1 %v93_v31  ;;  %1173 = vmatprep.subr.mxu0 %v76_v32 }
  0x61   :  { %1217 = vmatprep.subr.mxu1 %v92_v33 }
  0x63   :  { %1174 = vmatpush3.xpose.msra.mxu0 %v76_v32 }
  0x64   :  { %1218 = vmatpush3.xpose.msra.mxu1 %v92_v33  ;;  %1231 = vmatprep.subr.mxu0 %v123_v17 }
  0x65   :  { %1275 = vmatprep.subr.mxu1 %v139_v19 }
  0x66   :  { %1176 = vmatmul.mubr.f32.vlgmr.msra.gmra.mxu0 %v61_v34 }
  0x67   :  { %1220 = vmatmul.mubr.f32.vlgmr.msra.gmra.mxu1 %v69_v35  ;;  %1178 = vmatprep.mubr.f32.mxu0 %v62_v37 }
  0x68   :  { %1222 = vmatprep.mubr.f32.mxu1 %v70_v36  ;;  %1232 = vmatpush3.msra.mxu0 %v123_v17  ;;  %v117_v17 = vld [vmem:[#allocation10 + $0x48] sm:$0xff] }
  0x69   :  { %1233 = vmatprep.subr.mxu0 %v122_v18  ;;  %1276 = vmatpush3.msra.mxu1 %v139_v19 }
  0x6a   :  { %1179 = vmatmul.mubr.f32.gmra.mxu0 %v63_v39  ;;  %1277 = vmatprep.subr.mxu1 %v138_v20 }
  0x6b   :  { %1223 = vmatmul.mubr.f32.gmra.mxu1 %v71_v38  ;;  %1181 = vmatprep.mubr.f32.mxu0 %v64_v41 }
  0x6c   :  { %1225 = vmatprep.mubr.f32.mxu1 %v72_v40  ;;  %1234 = vmatpush3.msra.mxu0 %v122_v18  ;;  %v135_v18 = vld [vmem:[#allocation10 + $0xd8] sm:$0xff] }
  0x6d   :  { %1235 = vmatprep.subr.mxu0 %v121_v21  ;;  %1278 = vmatpush3.msra.mxu1 %v138_v20 }
  0x6e   :  { %1182 = vmatmul.mubr.f32.gmra.mxu0 %v65_v43  ;;  %1279 = vmatprep.subr.mxu1 %v137_v22 }
  0x6f   :  { %1226 = vmatmul.mubr.f32.gmra.mxu1 %v73_v42  ;;  %1184 = vmatprep.mubr.f32.mxu0 %v66_v45 }
  0x70   :  { %1228 = vmatprep.mubr.f32.mxu1 %v74_v44  ;;  %1236 = vmatpush3.msra.mxu0 %v121_v21 }
  0x71   :  { %1237 = vmatprep.subr.mxu0 %v120_v23  ;;  %1280 = vmatpush3.msra.mxu1 %v137_v22  ;;  %v134_v22 = vld [vmem:[#allocation10 + $0xd0] sm:$0xff] }
  0x72   :  { %1185 = vmatmul.mubr.f32.gmra.mxu0 %v67_v47 }
  0x73   :  { %1229 = vmatmul.mubr.f32.gmra.mxu1 %v75_v46  ;;  %1238 = vmatpush3.msra.mxu0 %v120_v23 }
  0x74   :  { %1239 = vmatprep.subr.mxu0 %v119_v24 }
  0x75   :  { %1240 = vmatpush3.msra.mxu0 %v119_v24  ;;  %v115_v24 = vld [vmem:[#allocation10 + $0x38] sm:$0xff] }
 0x126   :  { %v1177_v49 = vpop.f32.mrf.mxu0 }
 0x127   :  { %v1221_v50 = vpop.f32.mrf.mxu1  ;;  %v1532_v51 = vmul.f32 %v1177_v49, %v351_v48 }
 0x128   :  { %v206_v52 = vpop.f32.mrf.mxu0  ;;  %v1536_v55 = vmul.f32 %v1221_v50, %v351_v48 }
 0x129   :  { %v311_v53 = vpop.f32.mrf.mxu1  ;;  %v1534_v54 = vmul.f32 %v351_v48, %v206_v52  ;;  %370 = vmax.xlane.f32.xlu1 %v1532_v51 }
 0x12a   :  { %v1180_v57 = vpop.f32.mrf.mxu0  ;;  %v1540_v58 = vmul.f32 %v351_v48, %v311_v53 }
 0x12b   :  { %v1224_v56 = vpop.f32.mrf.mxu1  ;;  %368 = vmax.xlane.f32.xlu0 %v1534_v54  ;;  %v1546_v61 = vmul.f32 %v1180_v57, %v351_v48 }
 0x12c   :  { %v1543_v59 = vmul.f32 %v1224_v56, %v351_v48  ;;  %v216_v62 = vpop.f32.mrf.mxu0 }
 0x12d   :  { %386 = vmax.xlane.f32.xlu1 %v1536_v55  ;;  %v321_v60 = vpop.f32.mrf.mxu1  ;;  %v1552_v3 = vmul.f32 %v351_v48, %v216_v62 }
 0x12e   :  { %v1549_v0 = vmul.f32 %v351_v48, %v321_v60  ;;  %v1183_v1 = vpop.f32.mrf.mxu0 }
 0x12f   :  { %384 = vmax.xlane.f32.xlu0 %v1540_v58  ;;  %v1227_v63 = vpop.f32.mrf.mxu1  ;;  %v1558_v7 = vmul.f32 %v1183_v1, %v351_v48 }
 0x130   :  { %v1555_v4 = vmul.f32 %v1227_v63, %v351_v48  ;;  %v226_v5 = vpop.f32.mrf.mxu0 }
 0x131   :  { %390 = vmax.xlane.f32.xlu1 %v1543_v59  ;;  %v331_v2 = vpop.f32.mrf.mxu1  ;;  %v1564_v12 = vmul.f32 %v351_v48, %v226_v5 }
 0x132   :  { %v1186_v8 = vpop.f32.mrf.mxu0  ;;  %v1561_v9 = vmul.f32 %v351_v48, %v331_v2 }
 0x133   :  { %374 = vmax.xlane.f32.xlu0 %v1546_v61  ;;  %v1230_v6 = vpop.f32.mrf.mxu1  ;;  %v1576_v16 = vmul.f32 %v1186_v8, %v351_v48 }
 0x134   :  { %v236_v11 = vpop.f32.mrf.mxu0  ;;  %v1573_v15 = vmul.f32 %v1230_v6, %v351_v48 }
 0x135   :  { %388 = vmax.xlane.f32.xlu1 %v1549_v0  ;;  %v341_v10 = vpop.f32.mrf.mxu1  ;;  %v1570_v14 = vmul.f32 %v351_v48, %v236_v11  ;;  %v136_v11 = vld [vmem:[#allocation10 + $0xe0] sm:$0xff] }
 0x136   :  { %v1567_v13 = vmul.f32 %v351_v48, %v341_v10  ;;  %v118_v10 = vld [vmem:[#allocation10 + $0x50] sm:$0xff]  ;;  %1281 = vmatprep.subr.mxu1 %v136_v11 }
 0x137   :  { %372 = vmax.xlane.f32.xlu0 %v1552_v3  ;;  %1241 = vmatprep.subr.mxu0 %v118_v10 }
 0x138   :  { %1242 = vmatpush3.msra.mxu0 %v118_v10  ;;  %1282 = vmatpush3.msra.mxu1 %v136_v11 }
 0x139   :  { %394 = vmax.xlane.f32.xlu1 %v1555_v4  ;;  %1243 = vmatprep.subr.mxu0 %v117_v17 }
 0x13a   :  { %1283 = vmatprep.subr.mxu1 %v135_v18  ;;  %1244 = vmatpush3.msra.mxu0 %v117_v17 }
 0x13b   :  { %378 = vmax.xlane.f32.xlu0 %v1558_v7  ;;  %1284 = vmatpush3.msra.mxu1 %v135_v18 }
 0x13c   :  { %1285 = vmatprep.subr.mxu1 %v134_v22 }
 0x13d   :  { %392 = vmax.xlane.f32.xlu1 %v1561_v9  ;;  %1286 = vmatpush3.msra.mxu1 %v134_v22 }
 0x13f   :  { %376 = vmax.xlane.f32.xlu0 %v1564_v12 }
 0x141   :  { %396 = vmax.xlane.f32.xlu1 %v1567_v13 }
 0x143   :  { %380 = vmax.xlane.f32.xlu0 %v1570_v14 }
 0x145   :  { %398 = vmax.xlane.f32.xlu1 %v1573_v15 }
 0x147   :  { %382 = vmax.xlane.f32.xlu0 %v1576_v16 }
 0x1b2   :  { %v371_v25 = vpop.xlane.xlu1 %370 }
 0x1b3   :  { %v401_v26 = vsub.f32 %v1532_v51, %v371_v25  ;;  %v133_v25 = vld [vmem:[#allocation10 + $0xc8] sm:$0xff] }
 0x1b4   :  { %v369_v27 = vpop.xlane.xlu0 %368  ;;  %1287 = vmatprep.subr.mxu1 %v133_v25 }
 0x1b5   :  { %v418_v28 = vmul.f32 1.442695, %v401_v26  ;;  %v400_v29 = vsub.f32 %v1534_v54, %v369_v27  ;;  %v114_v27 = vld [vmem:[#allocation10 + $0x30] sm:$0xff]  ;;  %1288 = vmatpush3.msra.mxu1 %v133_v25 }
 0x1b6   :  { %v387_v30 = vpop.xlane.xlu1 %386 }
 0x1b7   :  { %1325 = vpow2.f32 %v418_v28  ;;  %v416_v31 = vmul.f32 1.442695, %v400_v29  ;;  %v409_v32 = vsub.f32 %v1536_v55, %v387_v30  ;;  %v132_v28 = vld [vmem:[#allocation10 + $0xc0] sm:$0xff]  ;;  %v113_v30 = vld [vmem:[#allocation10 + $0x28] sm:$0xff] }
 0x1b8   :  { %v385_v33 = vpop.xlane.xlu0 %384  ;;  %1289 = vmatprep.subr.mxu1 %v132_v28 }
 0x1b9   :  { %v434_v34 = vmul.f32 1.442695, %v409_v32  ;;  %v408_v35 = vsub.f32 %v1540_v58, %v385_v33  ;;  %1327 = vpow2.f32 %v416_v31  ;;  %v131_v31 = vld [vmem:[#allocation10 + $0xb8] sm:$0xff]  ;;  %1290 = vmatpush3.msra.mxu1 %v132_v28  ;;  %v112_v33 = vld [vmem:[#allocation10 + $0x20] sm:$0xff] }
 0x1ba   :  { %v391_v36 = vpop.xlane.xlu1 %390  ;;  %1291 = vmatprep.subr.mxu1 %v131_v31 }
 0x1bb   :  { %1329 = vpow2.f32 %v434_v34  ;;  %v432_v37 = vmul.f32 1.442695, %v408_v35  ;;  %v411_v38 = vsub.f32 %v1543_v59, %v391_v36  ;;  %v130_v34 = vld [vmem:[#allocation10 + $0xb0] sm:$0xff]  ;;  %1292 = vmatpush3.msra.mxu1 %v131_v31  ;;  %v111_v36 = vld [vmem:[#allocation10 + $0x18] sm:$0xff] }
 0x1bc   :  { %v375_v39 = vpop.xlane.xlu0 %374  ;;  %1293 = vmatprep.subr.mxu1 %v130_v34 }
 0x1bd   :  { %v403_v40 = vsub.f32 %v1546_v61, %v375_v39  ;;  %1331 = vpow2.f32 %v432_v37  ;;  %v438_v42 = vmul.f32 1.442695, %v411_v38  ;;  %v129_v38 = vld [vmem:[#allocation10 + $0xa8] sm:$0xff]  ;;  %1294 = vmatpush3.msra.mxu1 %v130_v34 }
 0x1be   :  { %v389_v41 = vpop.xlane.xlu1 %388  ;;  %1295 = vmatprep.subr.mxu1 %v129_v38 }
 0x1bf   :  { %v422_v43 = vmul.f32 1.442695, %v403_v40  ;;  %v410_v44 = vsub.f32 %v1549_v0, %v389_v41  ;;  %v110_v40 = vld [vmem:[#allocation10 + $0x10] sm:$0xff]  ;;  %v128_v41 = vld [vmem:[#allocation10 + $0xa0] sm:$0xff]  ;;  %1296 = vmatpush3.msra.mxu1 %v129_v38 }
 0x1c0   :  { %v373_v45 = vpop.xlane.xlu0 %372  ;;  %1297 = vmatprep.subr.mxu1 %v128_v41 }
 0x1c1   :  { %1333 = vpow2.f32 %v422_v43  ;;  %v402_v46 = vsub.f32 %v1552_v3, %v373_v45  ;;  %v436_v48 = vmul.f32 1.442695, %v410_v44  ;;  %v109_v43 = vld [vmem:[#allocation10 + $0x8] sm:$0xff]  ;;  %v127_v44 = vld [vmem:[#allocation10 + $0x98] sm:$0xff]  ;;  %v108_v45 = vld [vmem:[#allocation10] sm:$0xff]  ;;  %1298 = vmatpush3.msra.mxu1 %v128_v41 }
 0x1c2   :  { %v395_v47 = vpop.xlane.xlu1 %394  ;;  %1335 = vpow2.f32 %v438_v42  ;;  %1299 = vmatprep.subr.mxu1 %v127_v44 }
 0x1c3   :  { %v420_v49 = vmul.f32 1.442695, %v402_v46  ;;  %v413_v50 = vsub.f32 %v1555_v4, %v395_v47  ;;  %v126_v46 = vld [vmem:[#allocation10 + $0x90] sm:$0xff]  ;;  %1300 = vmatpush3.msra.mxu1 %v127_v44  ;;  %v125_v47 = vld [vmem:[#allocation10 + $0x88] sm:$0xff] }
 0x1c4   :  { %v1589_v51 = vpop.eup %1325  ;;  %v379_v52 = vpop.xlane.xlu0 %378  ;;  %1301 = vmatprep.subr.mxu1 %v126_v46 }
 0x1c5   :  { %1337 = vpow2.f32 %v420_v49  ;;  %v405_v53 = vsub.f32 %v1558_v7, %v379_v52  ;;  %450 = vadd.xlane.f32.xlu0 %v1589_v51  ;;  %v442_v56 = vmul.f32 1.442695, %v413_v50  ;;  %1302 = vmatpush3.msra.mxu1 %v126_v46  ;;  %v515_v49 = vlaneseq }
 0x1c6   :  { %v393_v54 = vpop.xlane.xlu1 %392  ;;  %v1593_v55 = vpop.eup %1327  ;;  %1339 = vpow2.f32 %v436_v48  ;;  %v124_v48 = vld [vmem:[#allocation10 + $0x80] sm:$0xff]  ;;  %1303 = vmatprep.subr.mxu1 %v125_v47 }
 0x1c7   :  { %v426_v57 = vmul.f32 1.442695, %v405_v53  ;;  %v412_v58 = vsub.f32 %v1561_v9, %v393_v54  ;;  %1304 = vmatpush3.msra.mxu1 %v125_v47  ;;  %v1644_v50 = vshrl.u32 %v515_v49, 7  ;;  %v1647_v53 = vand.u32 127, %v515_v49 }
 0x1c8   :  { %v1596_v59 = vpop.eup %1329  ;;  %v377_v60 = vpop.xlane.xlu0 %376  ;;  %1305 = vmatprep.subr.mxu1 %v124_v48 }
 0x1c9   :  { %1341 = vpow2.f32 %v426_v57  ;;  %v404_v61 = vsub.f32 %v1564_v12, %v377_v60  ;;  %466 = vadd.xlane.f32.xlu1 %v1596_v59  ;;  %448 = vadd.xlane.f32.xlu0 %v1593_v55  ;;  %v440_v63 = vmul.f32 1.442695, %v412_v58  ;;  %v517_v52 = vadd.s32 8, %v1644_v50 }
 0x1ca   :  { %v397_v62 = vpop.xlane.xlu1 %396  ;;  %1343 = vpow2.f32 %v442_v56  ;;  %v1602_v2 = vpop.eup %1331  ;;  %1306 = vmatpush3.msra.mxu1 %v124_v48  ;;  %v544_v54 = vmul.u32 128, %v1644_v50  ;;  %v536_v57 = vadd.s32 64, %v1644_v50  ;;  %v518_v10 = vadd.s32 16, %v1644_v50 }
 0x1cb   :  { %v424_v0 = vmul.f32 1.442695, %v404_v61  ;;  %v414_v1 = vsub.f32 %v1567_v13, %v397_v62  ;;  %v545_v56 = vmul.u32 128, %v517_v52  ;;  %v537_v58 = vadd.s32 64, %v517_v52 }
 0x1cc   :  { %v381_v3 = vpop.xlane.xlu0 %380  ;;  %v560_v60 = vadd.s32 %v544_v54, %v1647_v53  ;;  %v1655_v61 = vstv %s577_s10  ;;  %v519_v11 = vadd.s32 24, %v1644_v50  ;;  %v520_v46 = vadd.s32 32, %v1644_v50 }
 0x1cd   :  { %1345 = vpow2.f32 %v424_v0  ;;  %v406_v4 = vsub.f32 %v1570_v14, %v381_v3  ;;  %464 = vadd.xlane.f32.xlu1 %v1602_v2  ;;  %v444_v7 = vmul.f32 1.442695, %v414_v1  ;;  %v561_v62 = vadd.s32 %v545_v56, %v1647_v53 }
 0x1ce   :  { %v1606_v5 = vpop.eup %1333  ;;  %v399_v6 = vpop.xlane.xlu1 %398  ;;  %1347 = vpow2.f32 %v440_v63  ;;  %v552_v63 = vmul.u32 128, %v536_v57  ;;  %v553_v0 = vmul.u32 128, %v537_v58  ;;  %v579_v1 = vadd.s32 %v1655_v61, %v560_v60 }
 0x1cf   :  { %v428_v8 = vmul.f32 1.442695, %v406_v4  ;;  %v415_v9 = vsub.f32 %v1573_v15, %v399_v6  ;;  %454 = vadd.xlane.f32.xlu0 %v1606_v5  ;;  %v1610_v12 = vpop.eup %1335  ;;  %v580_v3 = vadd.s32 %v1655_v61, %v561_v62  ;;  %v521_v52 = vadd.s32 40, %v1644_v50 }
 0x1d0   :  { %v383_v13 = vpop.xlane.xlu0 %382  ;;  %v568_v4 = vadd.s32 %v552_v63, %v1647_v53  ;;  %v569_v6 = vadd.s32 %v553_v0, %v1647_v53  ;;  %v540_v62 = vadd.s32 64, %v520_v46 }
 0x1d1   :  { %1349 = vpow2.f32 %v428_v8  ;;  %v407_v14 = vsub.f32 %v1576_v16, %v383_v13  ;;  %470 = vadd.xlane.f32.xlu1 %v1610_v12  ;;  %v446_v15 = vmul.f32 1.442695, %v415_v9  ;;  %v116_v16 = vld [vmem:[#allocation10 + $0x40] sm:$0xff]  ;;  %v596_v8 = vshrl.u32 %v580_v3, 16 }
 0x1d2   :  { %v1614_v19 = vpop.eup %1337  ;;  %1351 = vpow2.f32 %v444_v7  ;;  %1245 = vmatprep.subr.mxu0 %v116_v16  ;;  %v595_v7 = vshrl.u32 %v579_v1, 16  ;;  %v587_v9 = vadd.s32 %v1655_v61, %v568_v4  ;;  %v588_v13 = vadd.s32 %v1655_v61, %v569_v6 }
 0x1d3   :  { %v430_v20 = vmul.f32 1.442695, %v407_v14  ;;  %452 = vadd.xlane.f32.xlu0 %v1614_v19  ;;  %v1617_v21 = vpop.eup %1339  ;;  %1246 = vmatpush3.msra.mxu0 %v116_v16  ;;  %v612_v17 = vxor.u32 %v596_v8, %v580_v3  ;;  %v547_v16 = vmul.u32 128, %v519_v11  ;;  %v548_v4 = vmul.u32 128, %v520_v46 }
 0x1d4   :  { %1247 = vmatprep.subr.mxu0 %v115_v24  ;;  %v611_v14 = vxor.u32 %v595_v7, %v579_v1  ;;  %v603_v18 = vshrl.u32 %v587_v9, 16  ;;  %v604_v22 = vshrl.u32 %v588_v13, 16  ;;  %v522_v1 = vadd.s32 48, %v1644_v50 }
 0x1d5   :  { %1353 = vpow2.f32 %v430_v20  ;;  %468 = vadd.xlane.f32.xlu1 %v1617_v21  ;;  %1248 = vmatpush3.msra.mxu0 %v115_v24  ;;  %v538_v20 = vadd.s32 64, %v518_v10  ;;  %v539_v24 = vadd.s32 64, %v519_v11  ;;  %v541_v6 = vadd.s32 64, %v521_v52 }
 0x1d6   :  { %v1620_v23 = vpop.eup %1341  ;;  %1355 = vpow2.f32 %v446_v15  ;;  %1249 = vmatprep.subr.mxu0 %v114_v27  ;;  %v546_v15 = vmul.u32 128, %v518_v10  ;;  %v627_v25 = vmul.u32 73244475, %v611_v14  ;;  %v619_v28 = vxor.u32 %v603_v18, %v587_v9 }
 0x1d7   :  { %458 = vadd.xlane.f32.xlu0 %v1620_v23  ;;  %v1623_v26 = vpop.eup %1343  ;;  %1250 = vmatpush3.msra.mxu0 %v114_v27  ;;  %v628_v27 = vmul.u32 73244475, %v612_v17  ;;  %v554_v31 = vmul.u32 128, %v538_v20  ;;  %v620_v34 = vxor.u32 %v604_v22, %v588_v13  ;;  %v523_v20 = vadd.s32 56, %v1644_v50 }
 0x1d8   :  { %1251 = vmatprep.subr.mxu0 %v113_v30  ;;  %v643_v38 = vshrl.u32 %v627_v25, 16  ;;  %v635_v41 = vmul.u32 73244475, %v619_v28  ;;  %v549_v13 = vmul.u32 128, %v521_v52  ;;  %v564_v22 = vadd.s32 %v548_v4, %v1647_v53 }
 0x1d9   :  { %474 = vadd.xlane.f32.xlu1 %v1623_v26  ;;  %1252 = vmatpush3.msra.mxu0 %v113_v30  ;;  %v562_v30 = vadd.s32 %v546_v15, %v1647_v53  ;;  %v570_v44 = vadd.s32 %v554_v31, %v1647_v53  ;;  %v636_v47 = vmul.u32 73244475, %v620_v34  ;;  %v556_v14 = vmul.u32 128, %v540_v62 }
 0x1da   :  { %v1626_v29 = vpop.eup %1345  ;;  %1253 = vmatprep.subr.mxu0 %v112_v33  ;;  %v659_v49 = vxor.u32 %v643_v38, %v627_v25  ;;  %v651_v56 = vshrl.u32 %v635_v41, 16  ;;  %v542_v15 = vadd.s32 64, %v522_v1  ;;  %v550_v25 = vmul.u32 128, %v522_v1 }
 0x1db   :  { %456 = vadd.xlane.f32.xlu0 %v1626_v29  ;;  %v1629_v32 = vpop.eup %1347  ;;  %1254 = vmatpush3.msra.mxu0 %v112_v33  ;;  %v563_v33 = vadd.s32 %v547_v16, %v1647_v53  ;;  %v589_v58 = vadd.s32 %v1655_v61, %v570_v44  ;;  %v652_v63 = vshrl.u32 %v636_v47, 16  ;;  %v565_v34 = vadd.s32 %v549_v13, %v1647_v53 }
 0x1dc   :  { %1255 = vmatprep.subr.mxu0 %v111_v36  ;;  %v675_v3 = vmul.u32 73244475, %v659_v49  ;;  %v667_v8 = vxor.u32 %v651_v56, %v635_v41  ;;  %v558_v41 = vmul.u32 128, %v542_v15  ;;  %v583_v50 = vadd.s32 %v1655_v61, %v564_v22 }
 0x1dd   :  { %472 = vadd.xlane.f32.xlu1 %v1629_v32  ;;  %1256 = vmatpush3.msra.mxu0 %v111_v36  ;;  %v555_v36 = vmul.u32 128, %v539_v24  ;;  %v605_v10 = vshrl.u32 %v589_v58, 16  ;;  %v668_v17 = vxor.u32 %v652_v63, %v636_v47  ;;  %v557_v24 = vmul.u32 128, %v541_v6 }
 0x1de   :  { %v1632_v35 = vpop.eup %1349  ;;  %1257 = vmatprep.subr.mxu0 %v110_v40  ;;  %v691_v16 = vshrl.u32 %v675_v3, 16  ;;  %v566_v46 = vadd.s32 %v550_v25, %v1647_v53  ;;  %v551_v52 = vmul.u32 128, %v523_v20  ;;  %v599_v4 = vshrl.u32 %v583_v50, 16 }
 0x1df   :  { %460 = vadd.xlane.f32.xlu0 %v1632_v35  ;;  %v1635_v37 = vpop.eup %1351  ;;  %1258 = vmatpush3.msra.mxu0 %v110_v40  ;;  %v644_v40 = vshrl.u32 %v628_v27, 16  ;;  %v571_v48 = vadd.s32 %v555_v36, %v1647_v53  ;;  %v572_v36 = vadd.s32 %v556_v14, %v1647_v53  ;;  %v684_v38 = vmul.u32 73244475, %v668_v17 }
 0x1e0   :  { %1259 = vmatprep.subr.mxu0 %v109_v43  ;;  %v1681_v44 = vxor.u32 %v691_v16, %v675_v3  ;;  %v615_v25 = vxor.u32 %v599_v4, %v583_v50 }
 0x1e1   :  { %476 = vadd.xlane.f32.xlu1 %v1635_v37  ;;  %1260 = vmatpush3.msra.mxu0 %v109_v43  ;;  %v581_v43 = vadd.s32 %v1655_v61, %v562_v30  ;;  %v660_v54 = vxor.u32 %v644_v40, %v628_v27  ;;  %v590_v0 = vadd.s32 %v1655_v61, %v571_v48  ;;  %v683_v27 = vmul.u32 73244475, %v667_v8 }
 0x1e2   :  { %v1638_v39 = vpop.eup %1353  ;;  %1261 = vmatprep.subr.mxu0 %v108_v45  ;;  %v621_v30 = vxor.u32 %v605_v10, %v589_v58  ;;  %v591_v58 = vadd.s32 %v1655_v61, %v572_v36  ;;  %v700_v62 = vshrl.u32 %v684_v38, 16  ;;  %v723_v3 = vand.u32 16777215, %v1681_v44 }
 0x1e3   :  { %462 = vadd.xlane.f32.xlu0 %v1638_v39  ;;  %v1641_v42 = vpop.eup %1355  ;;  %1262 = vmatpush3.msra.mxu0 %v108_v45  ;;  %v582_v45 = vadd.s32 %v1655_v61, %v563_v33  ;;  %v597_v57 = vshrl.u32 %v581_v43, 16  ;;  %v676_v7 = vmul.u32 73244475, %v660_v54  ;;  %v606_v18 = vshrl.u32 %v590_v0, 16 }
 0x1e4   :  { %v699_v47 = vshrl.u32 %v683_v27, 16  ;;  %v637_v49 = vmul.u32 73244475, %v621_v30  ;;  %v585_v8 = vadd.s32 %v1655_v61, %v566_v46  ;;  %v607_v17 = vshrl.u32 %v591_v58, 16 }
 0x1e5   :  { %478 = vadd.xlane.f32.xlu1 %v1641_v42  ;;  %v598_v60 = vshrl.u32 %v582_v45, 16  ;;  %v613_v9 = vxor.u32 %v597_v57, %v581_v43  ;;  %v692_v31 = vshrl.u32 %v676_v7, 16  ;;  %v622_v40 = vxor.u32 %v606_v18, %v590_v0 }
 0x1e6   :  { %v543_v43 = vadd.s32 64, %v523_v20  ;;  %v584_v57 = vadd.s32 %v1655_v61, %v565_v34  ;;  %v574_v0 = vadd.s32 %v558_v41, %v1647_v53  ;;  %v653_v10 = vshrl.u32 %v637_v49, 16 }
 0x1e7   :  { %v614_v11 = vxor.u32 %v598_v60, %v582_v45  ;;  %v629_v28 = vmul.u32 73244475, %v613_v9  ;;  %v573_v45 = vadd.s32 %v557_v24, %v1647_v53  ;;  %v1686_v54 = vxor.u32 %v692_v31, %v676_v7 }
 0x1e8   :  { %v638_v63 = vmul.u32 73244475, %v622_v40  ;;  %v559_v1 = vmul.u32 128, %v543_v43  ;;  %v1694_v7 = vxor.u32 %v699_v47, %v683_v27  ;;  %v600_v14 = vshrl.u32 %v584_v57, 16 }
 0x1e9   :  { %v630_v33 = vmul.u32 73244475, %v614_v11  ;;  %v645_v48 = vshrl.u32 %v629_v28, 16  ;;  %v592_v6 = vadd.s32 %v1655_v61, %v573_v45  ;;  %v567_v11 = vadd.s32 %v551_v52, %v1647_v53 }
 0x1ea   :  { %v1697_v20 = vxor.u32 %v700_v62, %v684_v38  ;;  %v654_v16 = vshrl.u32 %v638_v63, 16  ;;  %v593_v22 = vadd.s32 %v1655_v61, %v574_v0  ;;  %v575_v24 = vadd.s32 %v559_v1, %v1647_v53 }
 0x1eb   :  { %v646_v56 = vshrl.u32 %v630_v33, 16  ;;  %v661_v9 = vxor.u32 %v645_v48, %v629_v28  ;;  %v608_v27 = vshrl.u32 %v592_v6, 16  ;;  %v601_v28 = vshrl.u32 %v585_v8, 16 }
 0x1ec   :  { %v669_v31 = vxor.u32 %v653_v10, %v637_v49  ;;  %v724_v34 = vand.u32 16777215, %v1686_v54  ;;  %v616_v40 = vxor.u32 %v600_v14, %v584_v57  ;;  %v623_v38 = vxor.u32 %v607_v17, %v591_v58 }
 0x1ed   :  { %v662_v13 = vxor.u32 %v646_v56, %v630_v33  ;;  %v677_v30 = vmul.u32 73244475, %v661_v9  ;;  %v586_v33 = vadd.s32 %v1655_v61, %v567_v11  ;;  %v731_v43 = vand.u32 16777215, %v1694_v7 }
 0x1ee   :  { %v670_v44 = vxor.u32 %v654_v16, %v638_v63  ;;  %v609_v45 = vshrl.u32 %v593_v22, 16  ;;  %v594_v53 = vadd.s32 %v1655_v61, %v575_v24  ;;  %v631_v50 = vmul.u32 73244475, %v615_v25 }
 0x1ef   :  { %v678_v36 = vmul.u32 73244475, %v662_v13  ;;  %v624_v46 = vxor.u32 %v608_v27, %v592_v6  ;;  %v617_v47 = vxor.u32 %v601_v28, %v585_v8  ;;  %v732_v49 = vand.u32 16777215, %v1697_v20 }
 0x1f0   :  { %v693_v52 = vshrl.u32 %v677_v30, 16  ;;  %v685_v56 = vmul.u32 73244475, %v669_v31  ;;  %v602_v54 = vshrl.u32 %v586_v33, 16  ;;  %v632_v57 = vmul.u32 73244475, %v616_v40 }
 0x1f1   :  { %v639_v58 = vmul.u32 73244475, %v623_v38  ;;  %v686_v0 = vmul.u32 73244475, %v670_v44  ;;  %v625_v63 = vxor.u32 %v609_v45, %v593_v22  ;;  %v610_v1 = vshrl.u32 %v594_v53, 16 }
 0x1f2   :  { %vm1706_vm0 = vcmp.ge.s32.totalorder %v723_v3, 8388608  ;;  %v647_v4 = vshrl.u32 %v631_v50, 16  ;;  %v640_v6 = vmul.u32 73244475, %v624_v46  ;;  %v633_v8 = vmul.u32 73244475, %v617_v47 }
 0x1f3   :  { %vm1710_vm1 = vcmp.ge.s32.totalorder %v724_v34, 8388608  ;;  %v709_v10 = vxor.u32 %v693_v52, %v677_v30  ;;  %v701_v11 = vshrl.u32 %v685_v56, 16  ;;  %v618_v13 = vxor.u32 %v602_v54, %v586_v33 }
 0x1f4   :  { %v648_v17 = vshrl.u32 %v632_v57, 16  ;;  %v655_v3 = vshrl.u32 %v639_v58, 16  ;;  %vm1716_vm2 = vcmp.ge.s32.totalorder %v731_v43, 8388608  ;;  %v702_v16 = vshrl.u32 %v686_v0, 16 }
 0x1f5   :  { %v641_v22 = vmul.u32 73244475, %v625_v63  ;;  %v1720_v24 = vxor.u32 %v610_v1, %v594_v53  ;;  %v1722_v25 = vxor.u32 %v647_v4, %v631_v50  ;;  %v656_v27 = vshrl.u32 %v640_v6, 16 }
 0x1f6   :  { %v649_v28 = vshrl.u32 %v633_v8, 16  ;;  %vm1724_vm3 = vcmp.ge.s32.totalorder %v732_v49, 8388608  ;;  %v725_v34 = vand.u32 16777215, %v709_v10  ;;  %v634_v40 = vmul.u32 73244475, %v618_v13 }
 0x1f7   :  { %v1730_v44 = vxor.u32 %v648_v17, %v632_v57  ;;  %v1732_v45 = vxor.u32 %v655_v3, %v639_v58  ;;  %v657_v46 = vshrl.u32 %v641_v22, 16  ;;  %v642_v47 = vmul.u32 73244475, %v1720_v24 }
 0x1f8   :  { %v679_v49 = vmul.u32 73244475, %v1722_v25  ;;  %v1739_v52 = vxor.u32 %v656_v27, %v640_v6  ;;  %v650_v58 = vshrl.u32 %v634_v40, 16  ;;  %vm1748_vm4 = vcmp.ge.s32.totalorder %v725_v34, 8388608 }
 0x1f9   :  { %v1753_v4 = vxor.u32 %v657_v46, %v641_v22  ;;  %v658_v6 = vshrl.u32 %v642_v47, 16 }
 0x1fa   :  { %v688_v61 = vmul.u32 73244475, %v1739_v52  ;;  %v695_v13 = vshrl.u32 %v679_v49, 16  ;;  %v666_v17 = vxor.u32 %v650_v58, %v634_v40 }
 0x1fb   :  { %v689_v27 = vmul.u32 73244475, %v1753_v4 }
 0x1fc   :  { %v711_v40 = vxor.u32 %v695_v13, %v679_v49 }
 0x1fe   :  { %v727_v52 = vand.u32 16777215, %v711_v40 }
 0x200   :  { %vm743_vm8 = vcmp.ge.s32.totalorder %v727_v52, 8388608 }
 0x24e   :  { %v451_v60 = vpop.xlane.xlu0 %450 }
 0x24f   :  { %1357 = vrcp.f32 %v451_v60  ;;  %v694_v60 = vshrl.u32 %v678_v36, 16 }
 0x251   :  { %v1714_v14 = vxor.u32 %v694_v60, %v678_v36  ;;  %v717_v36 = vxor.u32 %v701_v11, %v685_v56 }
 0x252   :  { %v467_v18 = vpop.xlane.xlu1 %466  ;;  %v449_v15 = vpop.xlane.xlu0 %448 }
 0x253   :  { %1359 = vrcp.f32 %v467_v18  ;;  %v726_v43 = vand.u32 16777215, %v1714_v14 }
 0x254   :  { %1361 = vrcp.f32 %v449_v15 }
 0x255   :  { %vm1761_vm5 = vcmp.ge.s32.totalorder %v726_v43, 8388608 }
 0x256   :  { %v465_v41 = vpop.xlane.xlu1 %464 }
 0x257   :  { %1363 = vrcp.f32 %v465_v41 }
 0x258   :  { %v455_v48 = vpop.xlane.xlu0 %454 }
 0x259   :  { %1365 = vrcp.f32 %v455_v48  ;;  %v1736_v48 = vxor.u32 %v702_v16, %v686_v0  ;;  %v680_v0 = vmul.u32 73244475, %v1730_v44 }
 0x25a   :  { %v471_v62 = vpop.xlane.xlu1 %470 }
 0x25b   :  { %1367 = vrcp.f32 %v471_v62  ;;  %v734_v9 = vand.u32 16777215, %v1736_v48 }
 0x25c   :  { %v453_v7 = vpop.xlane.xlu0 %452  ;;  %v1358_v18 = vpop.eup %1357 }
 0x25d   :  { %1369 = vrcp.f32 %v453_v7  ;;  %v497_v41 = vmul.f32 %v1358_v18, %v1589_v51  ;;  %v1741_v51 = vxor.u32 %v649_v28, %v633_v8  ;;  %v733_v7 = vand.u32 16777215, %v717_v36 }
 0x25e   :  { %v469_v15 = vpop.xlane.xlu1 %468  ;;  %v674_v28 = vxor.u32 %v658_v6, %v642_v47  ;;  %vm750_vm7 = vcmp.ge.s32.totalorder %v734_v9, 8388608 }
 0x25f   :  { %1371 = vrcp.f32 %v469_v15  ;;  %v756_v62 = vmul.f32 2.0, %v497_v41  ;;  %v681_v14 = vmul.u32 73244475, %v1741_v51  ;;  %v696_v15 = vshrl.u32 %v680_v0, 16 }
 0x260   :  { %v1360_v30 = vpop.eup %1359  ;;  %v459_v31 = vpop.xlane.xlu0 %458  ;;  %vm1771_vm6 = vcmp.ge.s32.totalorder %v733_v7, 8388608  ;;  %v682_v41 = vmul.u32 73244475, %v666_v17  ;;  %v690_v46 = vmul.u32 73244475, %v674_v28 }
 0x261   :  { %v1362_v38 = vpop.eup %1361  ;;  %1373 = vrcp.f32 %v459_v31  ;;  %v505_v54 = vmul.f32 %v1360_v30, %v1596_v59  ;;  %v687_v59 = vmul.u32 73244475, %v1732_v45  ;;  %v704_v31 = vshrl.u32 %v688_v61, 16 }
 0x262   :  { %v475_v53 = vpop.xlane.xlu1 %474  ;;  %v496_v50 = vmul.f32 %v1362_v38, %v1593_v55  ;;  %v697_v38 = vshrl.u32 %v681_v14, 16  ;;  %v712_v44 = vxor.u32 %v696_v15, %v680_v0  ;;  %v698_v51 = vshrl.u32 %v682_v41, 16 }
 0x263   :  { %1375 = vrcp.f32 %v475_v53  ;;  %v764_v10 = vmul.f32 2.0, %v505_v54  ;;  %v703_v25 = vshrl.u32 %v687_v59, 16 }
 0x264   :  { %v1364_v56 = vpop.eup %1363  ;;  %v457_v60 = vpop.xlane.xlu0 %456  ;;  %v755_v57 = vmul.f32 2.0, %v496_v50  ;;  %v705_v50 = vshrl.u32 %v689_v27, 16  ;;  %v728_v54 = vand.u32 16777215, %v712_v44  ;;  %v714_v6 = vxor.u32 %v698_v51, %v682_v41 }
 0x265   :  { %1377 = vrcp.f32 %v457_v60  ;;  %v504_v55 = vmul.f32 %v1364_v56, %v1602_v2 }
 0x266   :  { %1263 = vmatprep.mubr.msk.f32.mxu0 %vm1706_vm0, %v755_v57  ;;  %v473_v63 = vpop.xlane.xlu1 %472  ;;  %v1366_v8 = vpop.eup %1365  ;;  %vm744_vm9 = vcmp.ge.s32.totalorder %v728_v54, 8388608 }
 0x267   :  { %1379 = vrcp.f32 %v473_v63  ;;  %1264 = vmatmul.mubr.msk.f32.vlgmr.msra.gmra.mxu0 %vm1710_vm1, %v756_v62  ;;  %v763_v2 = vmul.f32 2.0, %v504_v55  ;;  %v499_v24 = vmul.f32 %v1366_v8, %v1606_v5  ;;  %v721_v62 = vxor.u32 %v705_v50, %v689_v27 }
 0x268   :  { %v461_v11 = vpop.xlane.xlu0 %460  ;;  %v1368_v3 = vpop.eup %1367  ;;  %v706_v55 = vshrl.u32 %v690_v46, 16 }
 0x269   :  { %1381 = vrcp.f32 %v461_v11  ;;  %1307 = vmatprep.mubr.msk.f32.mxu1 %vm1716_vm2, %v763_v2  ;;  %v507_v33 = vmul.f32 %v1368_v3, %v1610_v12  ;;  %v758_v53 = vmul.f32 2.0, %v499_v24  ;;  %v720_v12 = vxor.u32 %v704_v31, %v688_v61 }
 0x26a   :  { %v1370_v16 = vpop.eup %1369  ;;  %1308 = vmatmul.mubr.msk.f32.vlgmr.msra.gmra.mxu1 %vm1724_vm3, %v764_v10  ;;  %v477_v22 = vpop.xlane.xlu1 %476  ;;  %v722_v10 = vxor.u32 %v706_v55, %v690_v46 }
 0x26b   :  { %1383 = vrcp.f32 %v477_v22  ;;  %v498_v20 = vmul.f32 %v1370_v16, %v1614_v19  ;;  %v719_v19 = vxor.u32 %v703_v25, %v687_v59  ;;  %v766_v49 = vmul.f32 2.0, %v507_v33 }
 0x26c   :  { %v1372_v34 = vpop.eup %1371  ;;  %v463_v36 = vpop.xlane.xlu0 %462  ;;  %v736_v63 = vand.u32 16777215, %v720_v12  ;;  %v738_v18 = vand.u32 16777215, %v722_v10 }
 0x26d   :  { %1385 = vrcp.f32 %v463_v36  ;;  %v757_v5 = vmul.f32 2.0, %v498_v20  ;;  %v506_v43 = vmul.f32 %v1372_v34, %v1617_v21  ;;  %v713_v21 = vxor.u32 %v697_v38, %v681_v14 }
 0x26e   :  { %v479_v45 = vpop.xlane.xlu1 %478  ;;  %v1374_v47 = vpop.eup %1373  ;;  %v735_v58 = vand.u32 16777215, %v719_v19  ;;  %vm752_vm11 = vcmp.ge.s32.totalorder %v736_v63, 8388608  ;;  %vm754_vm15 = vcmp.ge.s32.totalorder %v738_v18, 8388608 }
 0x26f   :  { %1387 = vrcp.f32 %v479_v45  ;;  %1266 = vmatprep.mubr.msk.f32.mxu0 %vm1748_vm4, %v757_v5  ;;  %v765_v48 = vmul.f32 2.0, %v506_v43  ;;  %v501_v57 = vmul.f32 %v1374_v47, %v1620_v23  ;;  %v729_v4 = vand.u32 16777215, %v713_v21 }
 0x270   :  { %1267 = vmatmul.mubr.msk.f32.gmra.mxu0 %vm1761_vm5, %v758_v53  ;;  %v1376_v56 = vpop.eup %1375  ;;  %vm751_vm10 = vcmp.ge.s32.totalorder %v735_v58, 8388608  ;;  %v737_v23 = vand.u32 16777215, %v721_v62 }
 0x271   :  { %1310 = vmatprep.mubr.msk.f32.mxu1 %vm1771_vm6, %v765_v48  ;;  %v509_v59 = vmul.f32 %v1376_v56, %v1623_v26  ;;  %v760_v61 = vmul.f32 2.0, %v501_v57  ;;  %vm745_vm12 = vcmp.ge.s32.totalorder %v729_v4, 8388608  ;;  %v730_v26 = vand.u32 16777215, %v714_v6 }
 0x272   :  { %v1378_v60 = vpop.eup %1377  ;;  %1311 = vmatmul.mubr.msk.f32.gmra.mxu1 %vm750_vm7, %v766_v49  ;;  %vm753_vm13 = vcmp.ge.s32.totalorder %v737_v23, 8388608 }
 0x273   :  { %v500_v0 = vmul.f32 %v1378_v60, %v1626_v29  ;;  %v768_v14 = vmul.f32 2.0, %v509_v59  ;;  %vm746_vm14 = vcmp.ge.s32.totalorder %v730_v26, 8388608 }
 0x274   :  { %v1380_v1 = vpop.eup %1379 }
 0x275   :  { %v759_v8 = vmul.f32 2.0, %v500_v0  ;;  %v508_v2 = vmul.f32 %v1380_v1, %v1629_v32 }
 0x276   :  { %v1382_v7 = vpop.eup %1381 }
 0x277   :  { %1269 = vmatprep.mubr.msk.f32.mxu0 %vm743_vm8, %v759_v8  ;;  %v767_v11 = vmul.f32 2.0, %v508_v2  ;;  %v502_v29 = vmul.f32 %v1382_v7, %v1632_v35 }
 0x278   :  { %v1384_v13 = vpop.eup %1383  ;;  %1270 = vmatmul.mubr.msk.f32.gmra.mxu0 %vm744_vm9, %v760_v61 }
 0x279   :  { %1313 = vmatprep.mubr.msk.f32.mxu1 %vm751_vm10, %v767_v11  ;;  %v761_v17 = vmul.f32 2.0, %v502_v29  ;;  %v510_v3 = vmul.f32 %v1384_v13, %v1635_v37 }
 0x27a   :  { %v1386_v32 = vpop.eup %1385  ;;  %1314 = vmatmul.mubr.msk.f32.gmra.mxu1 %vm752_vm11, %v768_v14 }
 0x27b   :  { %1272 = vmatprep.mubr.msk.f32.mxu0 %vm745_vm12, %v761_v17  ;;  %v769_v9 = vmul.f32 2.0, %v510_v3  ;;  %v503_v15 = vmul.f32 %v1386_v32, %v1638_v39 }
 0x27c   :  { %v1388_v16 = vpop.eup %1387 }
 0x27d   :  { %1316 = vmatprep.mubr.msk.f32.mxu1 %vm753_vm13, %v769_v9  ;;  %v762_v35 = vmul.f32 2.0, %v503_v15  ;;  %v511_v22 = vmul.f32 %v1388_v16, %v1641_v42 }
 0x27f   :  { %1273 = vmatmul.mubr.msk.f32.gmra.mxu0 %vm746_vm14, %v762_v35  ;;  %v770_v24 = vmul.f32 2.0, %v511_v22 }
 0x281   :  { %1317 = vmatmul.mubr.msk.f32.gmra.mxu1 %vm754_vm15, %v770_v24 }
 0x327   :  { %v1265_v25 = vpop.f32.mrf.mxu0 }
 0x328   :  { %998 = vst [vmem:[#allocation11 + $0x8] sm:$0xff] %v1265_v25 }
 0x329   :  { %v853_v37 = vpop.f32.mrf.mxu0 }
 0x32a   :  { %997 = vst [vmem:[#allocation11] sm:$0xff] %v853_v37  ;;  %v1309_v27 = vpop.f32.mrf.mxu1 }
 0x32b   :  { %1006 = vst [vmem:[#allocation11 + $0x48] sm:$0xff] %v1309_v27 }
 0x32c   :  { %v958_v28 = vpop.f32.mrf.mxu1 }
 0x32d   :  { %1005 = vst [vmem:[#allocation11 + $0x40] sm:$0xff] %v958_v28 }
 0x330   :  { %v1268_v20 = vpop.f32.mrf.mxu0 }
 0x331   :  { %1000 = vst [vmem:[#allocation11 + $0x18] sm:$0xff] %v1268_v20 }
 0x332   :  { %v863_v39 = vpop.f32.mrf.mxu0  ;;  %v1312_v30 = vpop.f32.mrf.mxu1 }
 0x333   :  { %999 = vst [vmem:[#allocation11 + $0x10] sm:$0xff] %v863_v39  ;;  %1008 = vst [vmem:[#allocation11 + $0x58] sm:$0xff] %v1312_v30 }
 0x334   :  { %v968_v31 = vpop.f32.mrf.mxu1 }
 0x335   :  { %1007 = vst [vmem:[#allocation11 + $0x50] sm:$0xff] %v968_v31 }
 0x338   :  { %v1271_v42 = vpop.f32.mrf.mxu0 }
 0x339   :  { %1002 = vst [vmem:[#allocation11 + $0x28] sm:$0xff] %v1271_v42 }
 0x33a   :  { %v873_v34 = vpop.f32.mrf.mxu0  ;;  %v1315_v36 = vpop.f32.mrf.mxu1 }
 0x33b   :  { %1001 = vst [vmem:[#allocation11 + $0x20] sm:$0xff] %v873_v34  ;;  %1010 = vst [vmem:[#allocation11 + $0x68] sm:$0xff] %v1315_v36 }
 0x33c   :  { %v978_v33 = vpop.f32.mrf.mxu1 }
 0x33d   :  { %1009 = vst [vmem:[#allocation11 + $0x60] sm:$0xff] %v978_v33 }
 0x33f   :  { %v1274_v40 = vpop.f32.mrf.mxu0 }
 0x340   :  { %1004 = vst [vmem:[#allocation11 + $0x38] sm:$0xff] %v1274_v40 }
 0x341   :  { %v883_v38 = vpop.f32.mrf.mxu0  ;;  %v1318_v41 = vpop.f32.mrf.mxu1 }
 0x342   :  { %1003 = vst [vmem:[#allocation11 + $0x30] sm:$0xff] %v883_v38  ;;  %1012 = vst [vmem:[#allocation11 + $0x78] sm:$0xff] %v1318_v41 }
 0x343   :  { %v988_v5 = vpop.f32.mrf.mxu1 }
 0x344   :  { %1011 = vst [vmem:[#allocation11 + $0x70] sm:$0xff] %v988_v5 }
 0x345   :  { %1460 = shalt.err (!%p1457_p5)
}
 0x346   :  { %1024 = dma.vmem_to_hbm [thread:$0]  %s1019_s11, 2048, %s1802_s5, [#allocation7], %s1477_s23, %s1477_s23, %s1478_s24  }
 0x347   :  { %1473 = dma.done.wait [#allocation7], 2048  }
 0x348   :  { %1474 = vsyncadd [#allocation7], 4294965248 }
 0x349   :  { %1028 = vsyncpa [#allocation6], 1 }
 0x34a   :  { %1029 = vsyncpa [#allocation9], 1 }
 0x34b   :  { %1030 = vsyncpa [#allocation7], 1 }

</bundles_post_ra>
